<compile_context>
chip_gen: v7x
topology: tpu7x:2x2x1
jax: 0.10.0
libtpu: 0.0.40
codegen_flags: <defaults>
</compile_context>

<pallas_src>
import functools

import jax
import jax.numpy as jnp
from jax.experimental import pallas as pl
from jax.experimental.pallas import tpu as pltpu

LANE = 128


def _hard_swish(x):
    # f_hard_swish(x) = relu6(x + 3) / 6 * x   (computed in f32 on the VPU)
    return jnp.clip(x + 3.0, 0.0, 6.0) * (1.0 / 6.0) * x


# ---------------------------------------------------------------------------
# Static layout of the packed parameter buffers
# ---------------------------------------------------------------------------
def _layout(inp_dim, mid_dim):
    assert 2 * mid_dim <= LANE, "lane-packed layout assumes 2*mid_dim <= 128"
    k00 = ((inp_dim + 15) // 16) * 16          # bf16 sublane-pack alignment
    return dict(
        k00=k00,
        # bf16 weight slabs (rows x 128 lanes), all starts multiples of 16
        w00=0,                     # rows [0, inp_dim)      cols [0, mid)
        w10=k00,                   # rows [0, mid)          cols [mid, 2mid)
        w11=k00 + LANE,            # rows [mid, 2mid)       cols [mid, 2mid)
        w20=k00 + 2 * LANE,        # rows [0, 2mid)         cols [0, 2mid)
        w21=k00 + 3 * LANE,        # rows [0, 2mid)         cols [0, 2mid)
        w_rows=k00 + 4 * LANE,
        # f32 aux buffer: one row per entry, 8-row-aligned
        b00=0, b10=8, b11=16, b20=24, b21=32, woa=40, wob=48, bo=56,
        aux_rows=64,
    )


# ---------------------------------------------------------------------------
# Kernel
# ---------------------------------------------------------------------------
def _build_kernel(L, inp_dim, mid):
    def kernel(x_ref, w_ref, a_ref, o_ref):
        f32 = jnp.float32
        bf16 = jnp.bfloat16

        def mm(x, row0, k):
            # bf16 MXU operands, f32 accumulation; slab reads are tile-aligned
            # full-lane views of the VMEM-resident bf16 weight buffer.
            return jnp.dot(x.astype(bf16), w_ref[row0:row0 + k, :],
                           preferred_element_type=f32)

        def arow(r):
            # (1, 128) f32 broadcast row at an 8-row-aligned offset.
            return a_ref[r:r + 1, :]

        x00 = x_ref[...]                                            # (tile_b, inp)
        # x10 in lanes [0, mid); padded lanes are exactly zero (zero W cols/bias).
        x10 = _hard_swish(mm(x00, L["w00"], inp_dim) + arow(L["b00"]))
        # x11, x12 land in lanes [mid, 2*mid) via the shifted w10/w11 slabs.
        x11 = _hard_swish(mm(x10, L["w10"], LANE) + arow(L["b10"]))
        x12 = _hard_swish(mm(x11, L["w11"], LANE) + arow(L["b11"])) + x11
        # Disjoint lane halves -> this add IS torch.cat((x10, x12), dim=1).
        x20 = x10 + x12
        # Fused dense20: one K=128 matmul instead of two split-K matmuls.
        x21 = _hard_swish(mm(x20, L["w20"], LANE) + arow(L["b20"]))
        # dense21 weight is already spectral-normalized (W / sigma) at pack time.
        x22 = _hard_swish(mm(x21, L["w21"], LANE) + arow(L["b21"])) + x21
        # TODO(synk): nn.Dropout with randomized p is a training-time stochastic op;
        #             this forward matches eval-mode (identity) semantics.
        # out_dim == 1 output layer: VPU multiply + XLU lane reduction (f32), no MXU.
        xo = (jnp.sum(x20 * arow(L["woa"]) + x22 * arow(L["wob"]),
                      axis=-1, keepdims=True)
              + a_ref[L["bo"]:L["bo"] + 1, 0:1])
        o_ref[...] = xo.astype(o_ref.dtype)

    return kernel


# ---------------------------------------------------------------------------
# Parameter construction / packing (done once, outside the hot path)
# ---------------------------------------------------------------------------
def make_params(key, inp_dim, mid_dim, out_dim=1):
    """Deterministic synthetic parameters (PyTorch nn.Linear-style uniform init)."""

    def linear(k, fan_in, fan_out):
        k1, k2 = jax.random.split(k)
        bound = 1.0 / jnp.sqrt(jnp.float32(fan_in))
        w = jax.random.uniform(k1, (fan_out, fan_in), jnp.float32, -bound, bound)
        b = jax.random.uniform(k2, (fan_out,), jnp.float32, -bound, bound)
        return w, b

    keys = jax.random.split(key, 7)
    w00, b00 = linear(keys[0], inp_dim, mid_dim)
    w10, b10 = linear(keys[1], mid_dim, mid_dim)
    w11, b11 = linear(keys[2], mid_dim, mid_dim)
    w20, b20 = linear(keys[3], 2 * mid_dim, 2 * mid_dim)
    w21, b21 = linear(keys[4], 2 * mid_dim, 2 * mid_dim)
    wo, bo = linear(keys[5], 4 * mid_dim, out_dim)

    # spectral_norm(dense21), n_power_iterations=1, deterministic u init
    u = jax.random.normal(keys[6], (2 * mid_dim,), jnp.float32)
    u = u / (jnp.linalg.norm(u) + 1e-12)
    v = w21.T @ u
    v = v / (jnp.linalg.norm(v) + 1e-12)
    u = w21 @ v
    u = u / (jnp.linalg.norm(u) + 1e-12)
    sigma = u @ (w21 @ v)
    w21 = w21 / sigma

    return dict(w00=w00, b00=b00, w10=w10, b10=b10, w11=w11, b11=b11,
                w20=w20, b20=b20, w21=w21, b21=b21, wo=wo, bo=bo)


def pack_params(params, inp_dim, mid_dim, out_dim=1):
    """Pack weights into a bf16 slab buffer and biases/output rows into an f32 buffer."""
    assert out_dim == 1, "VPU output-layer path assumes out_dim == 1"
    L = _layout(inp_dim, mid_dim)
    mid = mid_dim

    wbuf = jnp.zeros((L["w_rows"], LANE), jnp.float32)
    wbuf = wbuf.at[L["w00"]:L["w00"] + inp_dim, 0:mid].set(params["w00"].T)
    wbuf = wbuf.at[L["w10"]:L["w10"] + mid, mid:2 * mid].set(params["w10"].T)
    wbuf = wbuf.at[L["w11"] + mid:L["w11"] + 2 * mid, mid:2 * mid].set(params["w11"].T)
    wbuf = wbuf.at[L["w20"]:L["w20"] + 2 * mid, 0:2 * mid].set(params["w20"].T)
    wbuf = wbuf.at[L["w21"]:L["w21"] + 2 * mid, 0:2 * mid].set(params["w21"].T)
    wbuf = wbuf.astype(jnp.bfloat16)          # MXU operands in bf16

    aux = jnp.zeros((L["aux_rows"], LANE), jnp.float32)
    aux = aux.at[L["b00"], 0:mid].set(params["b00"])
    aux = aux.at[L["b10"], mid:2 * mid].set(params["b10"])
    aux = aux.at[L["b11"], mid:2 * mid].set(params["b11"])
    aux = aux.at[L["b20"], 0:2 * mid].set(params["b20"])
    aux = aux.at[L["b21"], 0:2 * mid].set(params["b21"])
    aux = aux.at[L["woa"], 0:2 * mid].set(params["wo"][0, 0:2 * mid])        # x10|x12
    aux = aux.at[L["wob"], 0:2 * mid].set(params["wo"][0, 2 * mid:4 * mid])  # x22
    aux = aux.at[L["bo"], 0:out_dim].set(params["bo"])
    return wbuf, aux


# ---------------------------------------------------------------------------
# Forward wrapper
# ---------------------------------------------------------------------------
def densenet_sn_forward(x00, wbuf, aux, *, mid_dim, out_dim=1, tile_b_max=2048):
    B, inp_dim = x00.shape
    L = _layout(inp_dim, mid_dim)

    # Pick the batch tile: >= 2 grid steps whenever possible so the "parallel"
    # axis shards across v7x's two TensorCores; big tiles amortize per-step cost.
    if B <= 8:
        tile_b = B
    else:
        tile_b = min(tile_b_max, ((pl.cdiv(B, 2) + 7) // 8) * 8)
    grid = (pl.cdiv(B, tile_b),)

    kernel = _build_kernel(L, inp_dim, mid_dim)

    mid = mid_dim
    flops = 2 * B * (inp_dim * mid + 2 * mid * mid
                     + 2 * (2 * mid) * (2 * mid) + 4 * mid * out_dim)
    bytes_accessed = (4 * B * (inp_dim + out_dim) + 2 * wbuf.size + 4 * aux.size)

    return pl.pallas_call(
        kernel,
        out_shape=jax.ShapeDtypeStruct((B, out_dim), jnp.float32),
        grid_spec=pltpu.PrefetchScalarGridSpec(
            num_scalar_prefetch=0,
            grid=grid,
            in_specs=[
                pl.BlockSpec((tile_b, inp_dim), lambda i: (i, 0)),
                # constant block index -> packed params stay VMEM-resident
                pl.BlockSpec(wbuf.shape, lambda i: (0, 0)),
                pl.BlockSpec(aux.shape, lambda i: (0, 0)),
            ],
            out_specs=pl.BlockSpec((tile_b, out_dim), lambda i: (i, 0)),
        ),
        compiler_params=pltpu.CompilerParams(
            dimension_semantics=("parallel",)),
        cost_estimate=pl.CostEstimate(flops=flops, transcendentals=0,
                                      bytes_accessed=bytes_accessed),
    )(x00, wbuf, aux)


# ---------------------------------------------------------------------------
# Pure-JAX references (eval-mode dropout)
# ---------------------------------------------------------------------------
def densenet_sn_ref(x00, params, *, mxu_bf16=False):
    """mxu_bf16=True mimics the kernel's numerics (bf16 dots, f32 accumulation,
    f32 elementwise, f32 output layer)."""
    f32 = jnp.float32

    def lin(x, w, b, cast):
        if cast:
            return jnp.dot(x.astype(jnp.bfloat16), w.T.astype(jnp.bfloat16),
                           preferred_element_type=f32) + b
        return jnp.dot(x, w.T, preferred_element_type=f32) + b

    c = mxu_bf16
    x10 = _hard_swish(lin(x00, params["w00"], params["b00"], c))
    x11 = _hard_swish(lin(x10, params["w10"], params["b10"], c))
    x12 = _hard_swish(lin(x11, params["w11"], params["b11"], c)) + x11
    x20 = jnp.concatenate([x10, x12], axis=1)
    x21 = _hard_swish(lin(x20, params["w20"], params["b20"], c))
    x22 = _hard_swish(lin(x21, params["w21"], params["b21"], c)) + x21
    x30 = jnp.concatenate([x20, x22], axis=1)
    return lin(x30, params["wo"], params["bo"], False)   # output layer stays f32


if __name__ == "__main__":
    inp_dim, mid_dim, out_dim = 16, 32, 1   # e.g. state_dim=12 + action_dim=4

    key = jax.random.PRNGKey(0)
    k_x1, k_x2, k_p = jax.random.split(key, 3)

    params = make_params(k_p, inp_dim, mid_dim, out_dim)
    wbuf, aux = pack_params(params, inp_dim, mid_dim, out_dim)   # packed ONCE

    fwd = jax.jit(functools.partial(densenet_sn_forward,
                                    mid_dim=mid_dim, out_dim=out_dim))

    # Small batch: single grid step, blocks equal full array dims.
    x_small = jax.random.normal(k_x1, (2, inp_dim), jnp.float32)
    out_small = jax.block_until_ready(fwd(x_small, wbuf, aux))
    assert out_small.shape == (2, out_dim)
    # Tight check vs the matched-numerics (bf16-MXU) reference.
    ref_bf = densenet_sn_ref(x_small, params, mxu_bf16=True)
    assert jnp.allclose(out_small, ref_bf, rtol=5e-3, atol=5e-3)
    # Loose sanity check vs the full-f32 reference (bf16 quantization tolerance).
    ref_f32 = densenet_sn_ref(x_small, params, mxu_bf16=False)
    assert jnp.allclose(out_small, ref_f32, rtol=5e-2, atol=5e-2)

    # Larger batch: 2 grid steps ("parallel" -> both v7x TCs), resident weights.
    x_big = jax.random.normal(k_x2, (1024, inp_dim), jnp.float32)
    out_big = jax.block_until_ready(fwd(x_big, wbuf, aux))
    assert out_big.shape == (1024, out_dim)
    ref_bf_big = densenet_sn_ref(x_big, params, mxu_bf16=True)
    assert jnp.allclose(out_big, ref_bf_big, rtol=5e-3, atol=5e-3)
    ref_f32_big = densenet_sn_ref(x_big, params, mxu_bf16=False)
    assert jnp.allclose(out_big, ref_f32_big, rtol=5e-2, atol=5e-2)

    print("KERNEL_OK")
</pallas_src>

<mosaic_0001>
module attributes {stable_mosaic.version = 11 : i64} {
  func.func @kernel(%arg0: i32, %arg1: memref<2x16xf32, #tpu.memory_space<vmem>>, %arg2: memref<528x128xbf16, #tpu.memory_space<vmem>>, %arg3: memref<64x128xf32, #tpu.memory_space<vmem>>, %arg4: memref<2x1xf32, #tpu.memory_space<vmem>>) attributes {dimension_semantics = [#tpu.dimension_semantics<parallel>], iteration_bounds = array<i64: 1>, scalar_prefetch = 0 : i64, scratch_operands = 0 : i64, tpu.core_type = #tpu.core_type<tc>, window_params = [{transform_indices = @transform_0, window_bounds = array<i64: 2, 16>}, {pipeline_mode = #tpu.pipeline_mode<synchronous>, transform_indices = @transform_1, window_bounds = array<i64: 528, 128>}, {pipeline_mode = #tpu.pipeline_mode<synchronous>, transform_indices = @transform_2, window_bounds = array<i64: 64, 128>}, {transform_indices = @transform_3, window_bounds = array<i64: 2, 1>}]} {
    %c0 = arith.constant 0 : index
    %c0_0 = arith.constant 0 : index
    %0 = vector.load %arg1[%c0, %c0_0] : memref<2x16xf32, #tpu.memory_space<vmem>>, vector<2x16xf32>
    %1 = arith.truncf %0 : vector<2x16xf32> to vector<2x16xbf16>
    %c0_1 = arith.constant 0 : index
    %c0_2 = arith.constant 0 : index
    %2 = vector.load %arg2[%c0_1, %c0_2] : memref<528x128xbf16, #tpu.memory_space<vmem>>, vector<16x128xbf16>
    %cst = arith.constant dense<0.000000e+00> : vector<2x128xf32>
    %3 = tpu.matmul %1, %2, %cst {dimension_numbers = #tpu.dot_dimension_numbers<[1], [0], [0], [1], [0, 0, 1, 1], [], []>} : vector<2x16xbf16>, vector<16x128xbf16>, vector<2x128xf32> -> vector<2x128xf32>
    %c0_3 = arith.constant 0 : index
    %c0_4 = arith.constant 0 : index
    %4 = vector.load %arg3[%c0_3, %c0_4] : memref<64x128xf32, #tpu.memory_space<vmem>>, vector<1x128xf32>
    %5 = vector.broadcast %4 : vector<1x128xf32> to vector<2x128xf32>
    %6 = arith.addf %3, %5 : vector<2x128xf32>
    %cst_5 = arith.constant 3.000000e+00 : f32
    %7 = vector.broadcast %cst_5 : f32 to vector<2x128xf32>
    %8 = arith.addf %6, %7 : vector<2x128xf32>
    %cst_6 = arith.constant 0.000000e+00 : f32
    %cst_7 = arith.constant 6.000000e+00 : f32
    %9 = vector.broadcast %cst_6 : f32 to vector<2x128xf32>
    %10 = arith.maximumf %9, %8 : vector<2x128xf32>
    %11 = vector.broadcast %cst_7 : f32 to vector<2x128xf32>
    %12 = arith.minimumf %11, %10 : vector<2x128xf32>
    %cst_8 = arith.constant 0.166666672 : f32
    %13 = vector.broadcast %cst_8 : f32 to vector<2x128xf32>
    %14 = arith.mulf %12, %13 : vector<2x128xf32>
    %15 = arith.mulf %14, %6 : vector<2x128xf32>
    %16 = arith.truncf %15 : vector<2x128xf32> to vector<2x128xbf16>
    %c16 = arith.constant 16 : index
    %c0_9 = arith.constant 0 : index
    %17 = vector.load %arg2[%c16, %c0_9] : memref<528x128xbf16, #tpu.memory_space<vmem>>, vector<128x128xbf16>
    %cst_10 = arith.constant dense<0.000000e+00> : vector<2x128xf32>
    %18 = tpu.matmul %16, %17, %cst_10 {dimension_numbers = #tpu.dot_dimension_numbers<[1], [0], [0], [1], [0, 0, 1, 1], [], []>} : vector<2x128xbf16>, vector<128x128xbf16>, vector<2x128xf32> -> vector<2x128xf32>
    %c8 = arith.constant 8 : index
    %c0_11 = arith.constant 0 : index
    %19 = vector.load %arg3[%c8, %c0_11] : memref<64x128xf32, #tpu.memory_space<vmem>>, vector<1x128xf32>
    %20 = vector.broadcast %19 : vector<1x128xf32> to vector<2x128xf32>
    %21 = arith.addf %18, %20 : vector<2x128xf32>
    %cst_12 = arith.constant 3.000000e+00 : f32
    %22 = vector.broadcast %cst_12 : f32 to vector<2x128xf32>
    %23 = arith.addf %21, %22 : vector<2x128xf32>
    %cst_13 = arith.constant 0.000000e+00 : f32
    %cst_14 = arith.constant 6.000000e+00 : f32
    %24 = vector.broadcast %cst_13 : f32 to vector<2x128xf32>
    %25 = arith.maximumf %24, %23 : vector<2x128xf32>
    %26 = vector.broadcast %cst_14 : f32 to vector<2x128xf32>
    %27 = arith.minimumf %26, %25 : vector<2x128xf32>
    %cst_15 = arith.constant 0.166666672 : f32
    %28 = vector.broadcast %cst_15 : f32 to vector<2x128xf32>
    %29 = arith.mulf %27, %28 : vector<2x128xf32>
    %30 = arith.mulf %29, %21 : vector<2x128xf32>
    %31 = arith.truncf %30 : vector<2x128xf32> to vector<2x128xbf16>
    %c144 = arith.constant 144 : index
    %c0_16 = arith.constant 0 : index
    %32 = vector.load %arg2[%c144, %c0_16] : memref<528x128xbf16, #tpu.memory_space<vmem>>, vector<128x128xbf16>
    %cst_17 = arith.constant dense<0.000000e+00> : vector<2x128xf32>
    %33 = tpu.matmul %31, %32, %cst_17 {dimension_numbers = #tpu.dot_dimension_numbers<[1], [0], [0], [1], [0, 0, 1, 1], [], []>} : vector<2x128xbf16>, vector<128x128xbf16>, vector<2x128xf32> -> vector<2x128xf32>
    %c16_18 = arith.constant 16 : index
    %c0_19 = arith.constant 0 : index
    %34 = vector.load %arg3[%c16_18, %c0_19] : memref<64x128xf32, #tpu.memory_space<vmem>>, vector<1x128xf32>
    %35 = vector.broadcast %34 : vector<1x128xf32> to vector<2x128xf32>
    %36 = arith.addf %33, %35 : vector<2x128xf32>
    %cst_20 = arith.constant 3.000000e+00 : f32
    %37 = vector.broadcast %cst_20 : f32 to vector<2x128xf32>
    %38 = arith.addf %36, %37 : vector<2x128xf32>
    %cst_21 = arith.constant 0.000000e+00 : f32
    %cst_22 = arith.constant 6.000000e+00 : f32
    %39 = vector.broadcast %cst_21 : f32 to vector<2x128xf32>
    %40 = arith.maximumf %39, %38 : vector<2x128xf32>
    %41 = vector.broadcast %cst_22 : f32 to vector<2x128xf32>
    %42 = arith.minimumf %41, %40 : vector<2x128xf32>
    %cst_23 = arith.constant 0.166666672 : f32
    %43 = vector.broadcast %cst_23 : f32 to vector<2x128xf32>
    %44 = arith.mulf %42, %43 : vector<2x128xf32>
    %45 = arith.mulf %44, %36 : vector<2x128xf32>
    %46 = arith.addf %45, %30 : vector<2x128xf32>
    %47 = arith.addf %15, %46 : vector<2x128xf32>
    %48 = arith.truncf %47 : vector<2x128xf32> to vector<2x128xbf16>
    %c272 = arith.constant 272 : index
    %c0_24 = arith.constant 0 : index
    %49 = vector.load %arg2[%c272, %c0_24] : memref<528x128xbf16, #tpu.memory_space<vmem>>, vector<128x128xbf16>
    %cst_25 = arith.constant dense<0.000000e+00> : vector<2x128xf32>
    %50 = tpu.matmul %48, %49, %cst_25 {dimension_numbers = #tpu.dot_dimension_numbers<[1], [0], [0], [1], [0, 0, 1, 1], [], []>} : vector<2x128xbf16>, vector<128x128xbf16>, vector<2x128xf32> -> vector<2x128xf32>
    %c24 = arith.constant 24 : index
    %c0_26 = arith.constant 0 : index
    %51 = vector.load %arg3[%c24, %c0_26] : memref<64x128xf32, #tpu.memory_space<vmem>>, vector<1x128xf32>
    %52 = vector.broadcast %51 : vector<1x128xf32> to vector<2x128xf32>
    %53 = arith.addf %50, %52 : vector<2x128xf32>
    %cst_27 = arith.constant 3.000000e+00 : f32
    %54 = vector.broadcast %cst_27 : f32 to vector<2x128xf32>
    %55 = arith.addf %53, %54 : vector<2x128xf32>
    %cst_28 = arith.constant 0.000000e+00 : f32
    %cst_29 = arith.constant 6.000000e+00 : f32
    %56 = vector.broadcast %cst_28 : f32 to vector<2x128xf32>
    %57 = arith.maximumf %56, %55 : vector<2x128xf32>
    %58 = vector.broadcast %cst_29 : f32 to vector<2x128xf32>
    %59 = arith.minimumf %58, %57 : vector<2x128xf32>
    %cst_30 = arith.constant 0.166666672 : f32
    %60 = vector.broadcast %cst_30 : f32 to vector<2x128xf32>
    %61 = arith.mulf %59, %60 : vector<2x128xf32>
    %62 = arith.mulf %61, %53 : vector<2x128xf32>
    %63 = arith.truncf %62 : vector<2x128xf32> to vector<2x128xbf16>
    %c400 = arith.constant 400 : index
    %c0_31 = arith.constant 0 : index
    %64 = vector.load %arg2[%c400, %c0_31] : memref<528x128xbf16, #tpu.memory_space<vmem>>, vector<128x128xbf16>
    %cst_32 = arith.constant dense<0.000000e+00> : vector<2x128xf32>
    %65 = tpu.matmul %63, %64, %cst_32 {dimension_numbers = #tpu.dot_dimension_numbers<[1], [0], [0], [1], [0, 0, 1, 1], [], []>} : vector<2x128xbf16>, vector<128x128xbf16>, vector<2x128xf32> -> vector<2x128xf32>
    %c32 = arith.constant 32 : index
    %c0_33 = arith.constant 0 : index
    %66 = vector.load %arg3[%c32, %c0_33] : memref<64x128xf32, #tpu.memory_space<vmem>>, vector<1x128xf32>
    %67 = vector.broadcast %66 : vector<1x128xf32> to vector<2x128xf32>
    %68 = arith.addf %65, %67 : vector<2x128xf32>
    %cst_34 = arith.constant 3.000000e+00 : f32
    %69 = vector.broadcast %cst_34 : f32 to vector<2x128xf32>
    %70 = arith.addf %68, %69 : vector<2x128xf32>
    %cst_35 = arith.constant 0.000000e+00 : f32
    %cst_36 = arith.constant 6.000000e+00 : f32
    %71 = vector.broadcast %cst_35 : f32 to vector<2x128xf32>
    %72 = arith.maximumf %71, %70 : vector<2x128xf32>
    %73 = vector.broadcast %cst_36 : f32 to vector<2x128xf32>
    %74 = arith.minimumf %73, %72 : vector<2x128xf32>
    %cst_37 = arith.constant 0.166666672 : f32
    %75 = vector.broadcast %cst_37 : f32 to vector<2x128xf32>
    %76 = arith.mulf %74, %75 : vector<2x128xf32>
    %77 = arith.mulf %76, %68 : vector<2x128xf32>
    %78 = arith.addf %77, %62 : vector<2x128xf32>
    %c40 = arith.constant 40 : index
    %c0_38 = arith.constant 0 : index
    %79 = vector.load %arg3[%c40, %c0_38] : memref<64x128xf32, #tpu.memory_space<vmem>>, vector<1x128xf32>
    %80 = vector.broadcast %79 : vector<1x128xf32> to vector<2x128xf32>
    %81 = arith.mulf %47, %80 : vector<2x128xf32>
    %c48 = arith.constant 48 : index
    %c0_39 = arith.constant 0 : index
    %82 = vector.load %arg3[%c48, %c0_39] : memref<64x128xf32, #tpu.memory_space<vmem>>, vector<1x128xf32>
    %83 = vector.broadcast %82 : vector<1x128xf32> to vector<2x128xf32>
    %84 = arith.mulf %78, %83 : vector<2x128xf32>
    %85 = arith.addf %81, %84 : vector<2x128xf32>
    %cst_40 = arith.constant dense<0.000000e+00> : vector<2xf32>
    %86 = vector.multi_reduction <add>, %85, %cst_40 [1] : vector<2x128xf32> to vector<2xf32>
    %87 = vector.shape_cast %86 : vector<2xf32> to vector<2x1xf32>
    %c56 = arith.constant 56 : index
    %c0_41 = arith.constant 0 : index
    %88 = vector.load %arg3[%c56, %c0_41] : memref<64x128xf32, #tpu.memory_space<vmem>>, vector<1x1xf32>
    %89 = vector.broadcast %88 : vector<1x1xf32> to vector<2x1xf32>
    %90 = arith.addf %87, %89 : vector<2x1xf32>
    %c0_42 = arith.constant 0 : index
    %c0_43 = arith.constant 0 : index
    %91 = vector.load %arg4[%c0_42, %c0_43] : memref<2x1xf32, #tpu.memory_space<vmem>>, vector<2x1xf32>
    tpu.vector_store %arg4[%c0_42, %c0_43], %90 {strides = array<i32>} : memref<2x1xf32, #tpu.memory_space<vmem>>, vector<2x1xf32>,
    return
  }
  func.func @transform_0(%arg0: i32) -> (i32, i32) {
    %c0_i32 = arith.constant 0 : i32
    %c0_i32_0 = arith.constant 0 : i32
    return %arg0, %c0_i32 : i32, i32
  }
  func.func @transform_1(%arg0: i32) -> (i32, i32) {
    %c0_i32 = arith.constant 0 : i32
    %c0_i32_0 = arith.constant 0 : i32
    %c0_i32_1 = arith.constant 0 : i32
    return %c0_i32, %c0_i32_0 : i32, i32
  }
  func.func @transform_2(%arg0: i32) -> (i32, i32) {
    %c0_i32 = arith.constant 0 : i32
    %c0_i32_0 = arith.constant 0 : i32
    %c0_i32_1 = arith.constant 0 : i32
    return %c0_i32, %c0_i32_0 : i32, i32
  }
  func.func @transform_3(%arg0: i32) -> (i32, i32) {
    %c0_i32 = arith.constant 0 : i32
    %c0_i32_0 = arith.constant 0 : i32
    return %arg0, %c0_i32 : i32, i32
  }
}

</mosaic_0001>

<bundles_post_ra>
// kernel: densenet_sn_forward.1
= control target key start
LH: loop header
LB: loop body
LE: loop exit
PB: predicated region body
PF: predicated region fallthrough
CT: control target
= control target key end

     0   :  { %8 = vsyncpa [#allocation3], 0  ;;  %s1006_s0 = inlined_call_operand.hbm [shape: f32[2,16], index: 0, kind: input, shape index: {}]   ;;  %s1007_s1 = inlined_call_operand.hbm [shape: bf16[528,128], index: 1, kind: input, shape index: {}]   ;;  %s1008_s2 = inlined_call_operand.hbm [shape: f32[64,128], index: 2, kind: input, shape index: {}]   ;;  %s1009_s3 = inlined_call_operand.vmem [shape: f32[2,1], index: 3, kind: output, shape index: {}]  }
   0x1   :  { %9 = vsyncpa [#allocation5], 0  ;;  %s890_s12 = smov [#allocation4]   ;;  %s820_s16 = scalar_lea.hbm %s1007_s1, 4224 }
   0x2   :  { %s25_s13 = sshll.u32 %s890_s12, 4  ;;  %p821_p0 = scmp.ne.s32.totalorder %s1007_s1, %s820_s16  ;;  %s26_s13 = int_to_ptr.vmem [resolvable:$true] %s25_s13 }
   0x3   :  { %p824_p1 = scmp.lt.u32.totalorder %s820_s16, %s1007_s1 }
   0x5   :  { %p826_p2 = pnand %p824_p1, %p821_p0 }
   0x7   :  { %829 = shalt.err (!%p826_p2)
}
   0x8   :  { %s830_s21 = scalar_lea.vmem %s26_s13, 4224  ;;  %p835_p4 = scmp.lt.s32.totalorder %s26_s13, %s26_s13 }
   0x9   :  { %p831_p3 = scmp.ne.s32.totalorder %s26_s13, %s830_s21  ;;  %p836_p5 = scmp.lt.s32.totalorder %s830_s21, %s830_s21 }
   0xb   :  { %p837_p6 = por %p836_p5, %p835_p4 }
   0xd   :  { %p838_p7 = pnand %p837_p6, %p831_p3 }
   0xf   :  { %841 = shalt.err (!%p838_p7)
}
  0x10   :  { %s891_s22 = smov 64   ;;  %s892_s23 = smov 4  }
  0x11   :  { %31 = dma.hbm_to_vmem [thread:$0]  %s1007_s1, 4224, %s26_s13, [#allocation5], %s891_s22, %s891_s22, %s892_s23  }
  0x12   :  { %s893_s26 = smov [#allocation2]   ;;  %s894_s28 = smov [#allocation6]  }
  0x13   :  { %s16_s27 = sshll.u32 %s893_s26, 4  ;;  %s37_s29 = sshll.u32 %s894_s28, 4  ;;  %s17_s27 = int_to_ptr.vmem [resolvable:$true] %s16_s27  ;;  %s38_s29 = int_to_ptr.vmem [resolvable:$true] %s37_s29 }
  0x14   :  { %s842_s5 = scalar_lea.hbm %s1006_s0, 32 }
  0x15   :  { %p843_p8 = scmp.ne.s32.totalorder %s1006_s0, %s842_s5  ;;  %p846_p9 = scmp.lt.u32.totalorder %s842_s5, %s1006_s0 }
  0x17   :  { %p848_p10 = pnand %p846_p9, %p843_p8 }
  0x19   :  { %851 = shalt.err (!%p848_p10)
}
  0x1a   :  { %s852_s1 = scalar_lea.vmem %s17_s27, 32  ;;  %p857_p12 = scmp.lt.s32.totalorder %s17_s27, %s17_s27 }
  0x1b   :  { %p853_p11 = scmp.ne.s32.totalorder %s17_s27, %s852_s1  ;;  %p858_p13 = scmp.lt.s32.totalorder %s852_s1, %s852_s1 }
  0x1d   :  { %p859_p0 = por %p858_p13, %p857_p12 }
  0x1f   :  { %p860_p1 = pnand %p859_p0, %p853_p11 }
  0x21   :  { %863 = shalt.err (!%p860_p1)
}
  0x22   :  { %19 = dma.hbm_to_vmem [thread:$0]  %s1006_s0, 32, %s17_s27, [#allocation3]  }
  0x23   :  { %s864_s14 = scalar_lea.hbm %s1008_s2, 1024 }
  0x24   :  { %p865_p2 = scmp.ne.s32.totalorder %s1008_s2, %s864_s14  ;;  %p868_p3 = scmp.lt.u32.totalorder %s864_s14, %s1008_s2 }
  0x26   :  { %p870_p4 = pnand %p868_p3, %p865_p2 }
  0x28   :  { %873 = shalt.err (!%p870_p4)
}
  0x29   :  { %s874_s19 = scalar_lea.vmem %s38_s29, 1024  ;;  %p879_p6 = scmp.lt.s32.totalorder %s38_s29, %s38_s29 }
  0x2a   :  { %p875_p5 = scmp.ne.s32.totalorder %s38_s29, %s874_s19  ;;  %p880_p7 = scmp.lt.s32.totalorder %s874_s19, %s874_s19 }
  0x2c   :  { %p881_p8 = por %p880_p7, %p879_p6 }
  0x2e   :  { %p882_p9 = pnand %p881_p8, %p875_p5 }
  0x30   :  { %885 = shalt.err (!%p882_p9)
}
  0x31   :  { %s895_s0 = smov 128   ;;  %s896_s20 = smov 8  }
  0x32   :  { %43 = dma.hbm_to_vmem [thread:$0]  %s1008_s2, 1024, %s38_s29, [#allocation5], %s895_s0, %s895_s0, %s896_s20  }
  0x33   :  { %886 = dma.done.wait [#allocation3], 32  }
  0x34   :  { %887 = vsyncadd [#allocation3], 4294967264 }
  0x35   :  { %888 = dma.done.wait [#allocation5], 5248  }
  0x36   :  { %889 = vsyncadd [#allocation5], 4294962048  ;;  %v897_v0 = vmov 0.0   ;;  %vm898_vm0 = vmmov 0   ;;  %v787_v1 = vld [vmem:[#allocation4] sm:$0xff]   ;;  %vm69_vm1 = vcmask 130048  }
  0x37   :  { %692 = vmatprep.subr.bf16.mxu0 %v897_v0  ;;  %694 = vmatprep.mubr.msk.bf16.mxu0 %vm898_vm0, %v897_v0  ;;  %v54_v2 = vld [vmem:[#allocation2] sm:$0x3]  ;;  %v788_v4 = vld [vmem:[#allocation4 + $0x8] sm:$0xff]   ;;  %v789_v5 = vld [vmem:[#allocation4 + $0x10] sm:$0xff]   ;;  %vm594_vm2 = vcmask 1041408   ;;  %vm604_vm3 = vcmask 1024  }
  0x38   :  { %698 = vmatprep.subr.bf16.mxu1 %v897_v0  ;;  %714 = vmatprep.mubr.msk.bf16.mxu1 %vm898_vm0, %v897_v0  ;;  %v55_v3 = vpack.c.bf16 %v54_v2, %v54_v2  ;;  %v790_v6 = vld [vmem:[#allocation4 + $0x18] sm:$0xff]   ;;  %v791_v7 = vld [vmem:[#allocation4 + $0x20] sm:$0xff]   ;;  %v792_v8 = vld [vmem:[#allocation4 + $0x28] sm:$0xff]  }
  0x39   :  { %693 = vmatpush3.bf16.msra.mxu0 %v787_v1  ;;  %699 = vmatpush3.bf16.msra.mxu1 %v788_v4  ;;  %v793_v9 = vld [vmem:[#allocation4 + $0x30] sm:$0xff]   ;;  %v794_v10 = vld [vmem:[#allocation4 + $0x38] sm:$0xff]   ;;  %v795_v11 = vld [vmem:[#allocation4 + $0x40] sm:$0xff]  }
  0x3a   :  { %718 = vmatprep.subr.bf16.mxu0 %v897_v0  ;;  %700 = vmatprep.subr.bf16.mxu1 %v897_v0  ;;  %v796_v12 = vld [vmem:[#allocation4 + $0x48] sm:$0xff]   ;;  %v797_v13 = vld [vmem:[#allocation4 + $0x50] sm:$0xff]   ;;  %v798_v14 = vld [vmem:[#allocation4 + $0x58] sm:$0xff]  }
  0x3b   :  { %v799_v15 = vld [vmem:[#allocation4 + $0x60] sm:$0xff]   ;;  %v612_v16 = vld [vmem:[#allocation6] ss:$0 sm:$0xff]  ;;  %v801_v29 = vld [vmem:[#allocation4 + $0x70] sm:$0xff]  }
  0x3c   :  { %695 = vmatmul.mubr.msk.bf16.vlgmr.msra.gmra.mrb[0].mxu0 %vm69_vm1, %v55_v3  ;;  %v800_v28 = vld [vmem:[#allocation4 + $0x68] sm:$0xff]   ;;  %v802_v30 = vld [vmem:[#allocation4 + $0x78] sm:$0xff]   ;;  %v803_v31 = vld [vmem:[#allocation4 + $0x80] sm:$0xff]  }
  0x3d   :  { %734 = vmatprep.mubr.msk.bf16.mxu0 %vm898_vm0, %v897_v0  ;;  %701 = vmatpush3.bf16.msra.mxu1 %v789_v5  ;;  %v804_v32 = vld [vmem:[#allocation4 + $0x88] sm:$0xff]   ;;  %v805_v33 = vld [vmem:[#allocation4 + $0x90] sm:$0xff]   ;;  %v806_v34 = vld [vmem:[#allocation4 + $0x98] sm:$0xff]  }
  0x3e   :  { %702 = vmatprep.subr.bf16.mxu1 %v897_v0  ;;  %719 = vmatpush3.bf16.msra.mxu0 %v796_v12  ;;  %v615_v35 = vld [vmem:[#allocation6 + $0x8] ss:$0 sm:$0xff]  ;;  %v807_v47 = vld [vmem:[#allocation4 + $0xa0] sm:$0xff]   ;;  %v808_v48 = vld [vmem:[#allocation4 + $0xa8] sm:$0xff]  }
  0x3f   :  { %720 = vmatprep.subr.bf16.mxu0 %v897_v0  ;;  %v809_v49 = vld [vmem:[#allocation4 + $0xb0] sm:$0xff]   ;;  %v810_v50 = vld [vmem:[#allocation4 + $0xb8] sm:$0xff]   ;;  %v811_v51 = vld [vmem:[#allocation4 + $0xc0] sm:$0xff]  }
  0x40   :  { %v812_v52 = vld [vmem:[#allocation4 + $0xc8] sm:$0xff]   ;;  %v813_v53 = vld [vmem:[#allocation4 + $0xd0] sm:$0xff]   ;;  %v814_v54 = vld [vmem:[#allocation4 + $0xd8] sm:$0xff]  }
  0x41   :  { %703 = vmatpush3.bf16.msra.mxu1 %v790_v6  ;;  %v815_v55 = vld [vmem:[#allocation4 + $0xe0] sm:$0xff]   ;;  %v624_v56 = vld [vmem:[#allocation6 + $0x10] ss:$0 sm:$0xff] }
  0x42   :  { %704 = vmatprep.subr.bf16.mxu1 %v897_v0  ;;  %721 = vmatpush3.bf16.msra.mxu0 %v797_v13 }
  0x43   :  { %722 = vmatprep.subr.bf16.mxu0 %v897_v0 }
  0x45   :  { %705 = vmatpush3.bf16.msra.mxu1 %v791_v7  ;;  %v816_v7 = vld [vmem:[#allocation4 + $0xe8] sm:$0xff]  }
  0x46   :  { %706 = vmatprep.subr.bf16.mxu1 %v897_v0  ;;  %723 = vmatpush3.bf16.msra.mxu0 %v798_v14 }
  0x47   :  { %724 = vmatprep.subr.bf16.mxu0 %v897_v0 }
  0x49   :  { %707 = vmatpush3.bf16.msra.mxu1 %v792_v8  ;;  %v817_v8 = vld [vmem:[#allocation4 + $0xf0] sm:$0xff]  }
  0x4a   :  { %708 = vmatprep.subr.bf16.mxu1 %v897_v0  ;;  %725 = vmatpush3.bf16.msra.mxu0 %v799_v15 }
  0x4b   :  { %726 = vmatprep.subr.bf16.mxu0 %v897_v0 }
  0x4d   :  { %709 = vmatpush3.bf16.msra.mxu1 %v793_v9  ;;  %v818_v9 = vld [vmem:[#allocation4 + $0xf8] sm:$0xff]  }
  0x4e   :  { %710 = vmatprep.subr.bf16.mxu1 %v897_v0  ;;  %727 = vmatpush3.bf16.msra.mxu0 %v800_v28 }
  0x4f   :  { %728 = vmatprep.subr.bf16.mxu0 %v897_v0 }
  0x51   :  { %711 = vmatpush3.bf16.msra.mxu1 %v794_v10  ;;  %v819_v10 = vld [vmem:[#allocation4 + $0x100] sm:$0xff]  }
  0x52   :  { %712 = vmatprep.subr.bf16.mxu1 %v897_v0  ;;  %729 = vmatpush3.bf16.msra.mxu0 %v801_v29 }
  0x53   :  { %730 = vmatprep.subr.bf16.mxu0 %v897_v0 }
  0x55   :  { %713 = vmatpush3.bf16.msra.mxu1 %v795_v11  ;;  %v633_v11 = vld [vmem:[#allocation6 + $0x18] ss:$0 sm:$0xff] }
  0x56   :  { %738 = vmatprep.subr.bf16.mxu1 %v897_v0  ;;  %731 = vmatpush3.bf16.msra.mxu0 %v802_v30 }
  0x57   :  { %732 = vmatprep.subr.bf16.mxu0 %v897_v0 }
  0x5a   :  { %733 = vmatpush3.bf16.msra.mxu0 %v803_v31 }
  0x5b   :  { %758 = vmatprep.subr.bf16.mxu0 %v897_v0 }
 0x10f   :  { %v107_v17 = vpop.f32.mrb[0].mxu0 }
 0x110   :  { %v108_v18 = vadd.f32 %v612_v16, %v107_v17  ;;  %v696_v19 = vpop.f32.mrb[1].mxu0 }
 0x111   :  { %v110_v20 = vpop.f32.mrb[2].mxu0 }
 0x112   :  { %v113_v21 = vadd.f32 3.0, %v108_v18  ;;  %v697_v22 = vpop.f32.mrb[3].mxu0 }
 0x114   :  { %v114_v23 = vmax.f32 %v113_v21, 0.0 }
 0x116   :  { %v115_v24 = vmin.f32 %v114_v23, 6.0  ;;  %v642_v23 = vld [vmem:[#allocation6 + $0x20] ss:$0 sm:$0xff] }
 0x118   :  { %v116_v25 = vmul.f32 0.16666667, %v115_v24 }
 0x11a   :  { %v976_v26 = vmul.f32 %v116_v25, %v108_v18 }
 0x11c   :  { %v118_v27 = vpack.c.bf16 %v976_v26, %v976_v26 }
 0x11e   :  { %715 = vmatmul.mubr.bf16.vlgmr.msra.gmra.mrb[0].mxu1 %v118_v27 }
 0x11f   :  { %754 = vmatprep.mubr.msk.bf16.mxu1 %vm898_vm0, %v897_v0  ;;  %739 = vmatpush3.bf16.msra.mxu1 %v804_v32 }
 0x120   :  { %740 = vmatprep.subr.bf16.mxu1 %v897_v0 }
 0x123   :  { %741 = vmatpush3.bf16.msra.mxu1 %v805_v33  ;;  %v651_v33 = vld [vmem:[#allocation6 + $0x28] ss:$0 sm:$0xff] }
 0x124   :  { %742 = vmatprep.subr.bf16.mxu1 %v897_v0 }
 0x127   :  { %743 = vmatpush3.bf16.msra.mxu1 %v806_v34  ;;  %v652_v34 = vld [vmem:[#allocation6 + $0x30] ss:$0 sm:$0xff] }
 0x128   :  { %744 = vmatprep.subr.bf16.mxu1 %v897_v0 }
 0x12b   :  { %745 = vmatpush3.bf16.msra.mxu1 %v807_v47 }
 0x12c   :  { %746 = vmatprep.subr.bf16.mxu1 %v897_v0 }
 0x12f   :  { %747 = vmatpush3.bf16.msra.mxu1 %v808_v48 }
 0x130   :  { %748 = vmatprep.subr.bf16.mxu1 %v897_v0 }
 0x133   :  { %749 = vmatpush3.bf16.msra.mxu1 %v809_v49 }
 0x134   :  { %750 = vmatprep.subr.bf16.mxu1 %v897_v0 }
 0x137   :  { %751 = vmatpush3.bf16.msra.mxu1 %v810_v50 }
 0x138   :  { %752 = vmatprep.subr.bf16.mxu1 %v897_v0 }
 0x13b   :  { %753 = vmatpush3.bf16.msra.mxu1 %v811_v51 }
 0x1f1   :  { %v222_v36 = vpop.f32.mrb[0].mxu1 }
 0x1f2   :  { %v223_v37 = vadd.f32 %v615_v35, %v222_v36  ;;  %v716_v38 = vpop.f32.mrb[1].mxu1 }
 0x1f3   :  { %v225_v39 = vpop.f32.mrb[2].mxu1 }
 0x1f4   :  { %v228_v40 = vadd.f32 3.0, %v223_v37  ;;  %v717_v41 = vpop.f32.mrb[3].mxu1 }
 0x1f6   :  { %v229_v42 = vmax.f32 %v228_v40, 0.0  ;;  %v653_v40 = vld [vmem:[#allocation6 + $0x38] ss:$0 sm:$0xff] }
 0x1f8   :  { %v230_v43 = vmin.f32 %v229_v42, 6.0 }
 0x1fa   :  { %v231_v44 = vmul.f32 0.16666667, %v230_v43 }
 0x1fc   :  { %v232_v45 = vmul.f32 %v231_v44, %v223_v37 }
 0x1fe   :  { %v233_v46 = vpack.c.bf16 %v232_v45, %v232_v45 }
 0x200   :  { %735 = vmatmul.mubr.bf16.vlgmr.msra.gmra.mrb[4].mxu0 %v233_v46 }
 0x201   :  { %774 = vmatprep.mubr.msk.bf16.mxu0 %vm898_vm0, %v897_v0  ;;  %759 = vmatpush3.bf16.msra.mxu0 %v812_v52 }
 0x202   :  { %760 = vmatprep.subr.bf16.mxu0 %v897_v0 }
 0x205   :  { %761 = vmatpush3.bf16.msra.mxu0 %v813_v53 }
 0x206   :  { %762 = vmatprep.subr.bf16.mxu0 %v897_v0 }
 0x209   :  { %763 = vmatpush3.bf16.msra.mxu0 %v814_v54 }
 0x20a   :  { %764 = vmatprep.subr.bf16.mxu0 %v897_v0 }
 0x20d   :  { %765 = vmatpush3.bf16.msra.mxu0 %v815_v55 }
 0x20e   :  { %766 = vmatprep.subr.bf16.mxu0 %v897_v0 }
 0x211   :  { %767 = vmatpush3.bf16.msra.mxu0 %v816_v7 }
 0x212   :  { %768 = vmatprep.subr.bf16.mxu0 %v897_v0 }
 0x215   :  { %769 = vmatpush3.bf16.msra.mxu0 %v817_v8 }
 0x216   :  { %770 = vmatprep.subr.bf16.mxu0 %v897_v0 }
 0x219   :  { %771 = vmatpush3.bf16.msra.mxu0 %v818_v9 }
 0x21a   :  { %772 = vmatprep.subr.bf16.mxu0 %v897_v0 }
 0x21d   :  { %773 = vmatpush3.bf16.msra.mxu0 %v819_v10 }
 0x2d3   :  { %v337_v57 = vpop.f32.mrb[4].mxu0 }
 0x2d4   :  { %v338_v58 = vadd.f32 %v624_v56, %v337_v57  ;;  %v736_v59 = vpop.f32.mrb[5].mxu0 }
 0x2d5   :  { %v340_v60 = vpop.f32.mrb[6].mxu0 }
 0x2d6   :  { %v343_v61 = vadd.f32 3.0, %v338_v58  ;;  %v737_v62 = vpop.f32.mrb[7].mxu0 }
 0x2d8   :  { %v344_v63 = vmax.f32 %v343_v61, 0.0 }
 0x2da   :  { %v345_v1 = vmin.f32 %v344_v63, 6.0 }
 0x2dc   :  { %v346_v2 = vmul.f32 0.16666667, %v345_v1 }
 0x2de   :  { %v347_v3 = vmul.f32 %v346_v2, %v338_v58 }
 0x2e0   :  { %v348_v4 = vadd.f32 %v347_v3, %v232_v45 }
 0x2e2   :  { %v349_v5 = vadd.f32 %v348_v4, %v976_v26 }
 0x2e4   :  { %v350_v6 = vpack.c.bf16 %v349_v5, %v349_v5  ;;  %v586_v36 = vmul.f32 %v651_v33, %v349_v5 }
 0x2e6   :  { %755 = vmatmul.mubr.bf16.vlgmr.msra.gmra.mrb[4].mxu1 %v350_v6 }
 0x3b9   :  { %v454_v12 = vpop.f32.mrb[4].mxu1 }
 0x3ba   :  { %v455_v13 = vadd.f32 %v633_v11, %v454_v12  ;;  %v756_v14 = vpop.f32.mrb[5].mxu1 }
 0x3bb   :  { %v457_v15 = vpop.f32.mrb[6].mxu1 }
 0x3bc   :  { %v460_v16 = vadd.f32 3.0, %v455_v13  ;;  %v757_v17 = vpop.f32.mrb[7].mxu1 }
 0x3be   :  { %v461_v18 = vmax.f32 %v460_v16, 0.0 }
 0x3c0   :  { %v462_v19 = vmin.f32 %v461_v18, 6.0 }
 0x3c2   :  { %v463_v20 = vmul.f32 0.16666667, %v462_v19 }
 0x3c4   :  { %v464_v21 = vmul.f32 %v463_v20, %v455_v13 }
 0x3c6   :  { %v465_v22 = vpack.c.bf16 %v464_v21, %v464_v21 }
 0x3c8   :  { %775 = vmatmul.mubr.bf16.vlgmr.msra.gmra.mrb[8].mxu0 %v465_v22 }
 0x49b   :  { %v569_v24 = vpop.f32.mrb[8].mxu0 }
 0x49c   :  { %v570_v25 = vadd.f32 %v642_v23, %v569_v24  ;;  %v776_v26 = vpop.f32.mrb[9].mxu0 }
 0x49d   :  { %v572_v0 = vpop.f32.mrb[10].mxu0 }
 0x49e   :  { %v575_v27 = vadd.f32 3.0, %v570_v25  ;;  %v777_v28 = vpop.f32.mrb[11].mxu0 }
 0x4a0   :  { %v576_v29 = vmax.f32 %v575_v27, 0.0 }
 0x4a2   :  { %v577_v30 = vmin.f32 %v576_v29, 6.0 }
 0x4a4   :  { %v578_v31 = vmul.f32 0.16666667, %v577_v30 }
 0x4a6   :  { %v579_v32 = vmul.f32 %v578_v31, %v570_v25 }
 0x4a8   :  { %v580_v35 = vadd.f32 %v579_v32, %v464_v21 }
 0x4aa   :  { %v592_v37 = vmul.f32 %v652_v34, %v580_v35 }
 0x4ac   :  { %v593_v38 = vadd.f32 %v592_v37, %v586_v36 }
 0x4ae   :  { %v595_v39 = vsel %vm594_vm2, %v593_v38, 0.0 }
 0x4af   :  { %596 = vadd.xlane.f32.xlu0 %v595_v39 }
 0x53c   :  { %v597_v41 = vpop.xlane.xlu0 %596 }
 0x53d   :  { %v603_v42 = vadd.f32 %v653_v40, %v597_v41 }
 0x53f   :  { %605 = vst.msk [vmem:[%s1009_s3] sm:$0x3] %vm604_vm3, %v603_v42 }
 0x540   :  { %610 = vsyncpa [#allocation3], 1 }
 0x541   :  { %611 = vsyncpa [#allocation5], 1 }

</bundles_post_ra>
